<compile_context>
chip_gen: v6e
topology: v6e:2x2x1
jax: 0.10.0
libtpu: 0.0.40
codegen_flags: <defaults>
</compile_context>

<pallas_src>
import numpy as np
import jax
import jax.numpy as jnp
from jax.experimental import pallas as pl
from jax.experimental.pallas import tpu as pltpu

# problem sizes (consistent with the PyTorch module: reduction_ratio=8)
N, C, H, W = 2, 16, 16, 16
HW = H * W
RED = 8
CR = C // RED            # hidden channels of the channel-attention MLP
KS = 7                   # spatial-attention conv kernel size
PAD = KS // 2


# --------------------------------------------------------------------------
# Pallas kernel: full CBAM forward for the whole (small) batch in one step.
# --------------------------------------------------------------------------
def _cbam_kernel(x_ref, fc_ref, cm_ref, o_ref):
    n, c, hw = x_ref.shape
    cr = (fc_ref.shape[0] - 3) // 2

    x = x_ref[...]                                        # (N, C, HW) f32

    # ---------------- channel attention ----------------
    avg = jnp.mean(x, axis=-1)                            # (N, C) lane reduce
    mx = jnp.max(x, axis=-1)                              # (N, C)
    pooled = jnp.concatenate([avg, mx], axis=0)           # (2N, C)

    # packed params (rows): [0:CR]=w1, [CR]=b1, [CR+1:2CR+1]=w2^T,
    #                       [2CR+1]=b2, [2CR+2,0]=conv bias
    w1 = fc_ref[0:cr, :]                                  # (CR, C)
    b1 = fc_ref[cr:cr + 1, 0:cr]                          # (1, CR)
    w2t = fc_ref[cr + 1:2 * cr + 1, :]                    # (CR, C)
    b2 = fc_ref[2 * cr + 1:2 * cr + 2, :]                 # (1, C)
    cb = fc_ref[2 * cr + 2:2 * cr + 3, 0:1]               # (1, 1)

    # tiny MLP on the VPU (broadcast-mul + reduce) -- no padded MXU dots
    h = jnp.sum(pooled[:, None, :] * w1[None, :, :], axis=-1) + b1     # (2N, CR)
    h = jnp.where(h > 0, h, 0.01 * h)                     # LeakyReLU(0.01)
    fc_out = jnp.sum(h[:, :, None] * w2t[None, :, :], axis=1) + b2     # (2N, C)

    ch_att = jax.nn.sigmoid(fc_out[:n] + fc_out[n:])      # (N, C)
    x_ca = x * ch_att[:, :, None]                         # (N, C, HW)

    # ---------------- spatial attention ----------------
    avg_c = jnp.mean(x_ca, axis=1)                        # (N, HW)
    max_c = jnp.max(x_ca, axis=1)                         # (N, HW)
    a_cat = jnp.concatenate([avg_c, max_c], axis=-1)      # (N, 2*HW), 128-aligned

    # 7x7 conv (incl. zero padding) unrolled into ONE lane-dense MXU matmul
    sp = jnp.dot(a_cat, cm_ref[...], preferred_element_type=jnp.float32)
    sp = jax.nn.sigmoid(sp + cb)                          # (N, HW)

    o_ref[...] = (x_ca * sp[:, None, :]).astype(o_ref.dtype)


# --------------------------------------------------------------------------
# Host-side (numpy, done ONCE per weight set) parameter preprocessing.
# --------------------------------------------------------------------------
def _pack_params_np(w1, b1, w2, b2, cb):
    """Pack MLP params + conv bias into one (2*CR+3, C) f32 block."""
    cr, c = w1.shape                                      # (CR, C)
    p = np.zeros((2 * cr + 3, c), np.float32)
    p[0:cr, :] = w1
    p[cr, 0:cr] = b1[:, 0]
    p[cr + 1:2 * cr + 1, :] = w2.T                        # (CR, C)
    p[2 * cr + 1, :] = b2[:, 0]
    p[2 * cr + 2, 0] = cb[0]
    return p


def _build_spatial_conv_matrix_np(cw4, h, w):
    """Unroll Conv2d(2, 1, KS, padding=KS//2) (incl. zero padding) into a dense
    (2*H*W, H*W) matrix M so conv(maps)[n, i*W+j] == concat(maps)[n] @ M[:, i*W+j]."""
    hw = h * w
    ks = cw4.shape[-1]
    pad = ks // 2
    m = np.zeros((2 * hw, hw), np.float32)
    for ch in range(2):
        for di in range(ks):
            for dj in range(ks):
                wv = float(cw4[0, ch, di, dj])
                for i in range(h):
                    pi = i + di - pad
                    if pi < 0 or pi >= h:
                        continue
                    for j in range(w):
                        pj = j + dj - pad
                        if pj < 0 or pj >= w:
                            continue
                        m[ch * hw + pi * w + pj, i * w + j] += wv
    return m


# --------------------------------------------------------------------------
# Factory: builds constants once, returns a jitted forward function.
# --------------------------------------------------------------------------
def make_cbam_pallas(w1, b1, w2, b2, cw4, cb, image_hw):
    h, w = image_hw
    hw = h * w

    # Scaling guard: dense conv-matrix trick is O(HW^2) VMEM; fine at 16x16
    # (512 KiB) but not at production feature-map sizes.
    if 2 * hw * hw * 4 > 8 * 1024 * 1024:
        # TODO(synk): tile the spatial matmul over HW / K blocks (BlockSpecs +
        # f32 accumulator) or use a shift/roll-based conv for large H, W.
        raise NotImplementedError("dense conv-matrix path only for small H*W")

    fc_packed = jnp.asarray(
        _pack_params_np(np.asarray(w1, np.float32), np.asarray(b1, np.float32),
                        np.asarray(w2, np.float32), np.asarray(b2, np.float32),
                        np.asarray(cb, np.float32)))
    conv_mat = jnp.asarray(
        _build_spatial_conv_matrix_np(np.asarray(cw4, np.float32), h, w))

    vmem = pl.BlockSpec(memory_space=pltpu.MemorySpace.VMEM)

    @jax.jit
    def fwd(x):
        n, c, hh, ww = x.shape
        hw_ = hh * ww
        x3 = x.reshape(n, c, hw_)                         # lane-dense layout
        cost = pl.CostEstimate(
            flops=int(2 * n * (2 * hw_) * hw_ + 4 * n * c * (c // RED)),
            transcendentals=int(n * c + n * hw_),
            bytes_accessed=int(2 * x3.size * 4 + conv_mat.size * 4
                               + fc_packed.size * 4),
        )
        out3 = pl.pallas_call(
            _cbam_kernel,
            out_shape=jax.ShapeDtypeStruct((n, c, hw_), x.dtype),
            in_specs=[vmem, vmem, vmem],
            out_specs=vmem,
            cost_estimate=cost,
        )(x3, fc_packed, conv_mat)
        return out3.reshape(n, c, hh, ww)

    return fwd


# --------------------------------------------------------------------------
# Pure-JAX reference matching the PyTorch module (for validation only).
# --------------------------------------------------------------------------
def cbam_reference(x, w1, b1, w2, b2, cw4, cb):
    avg = jnp.mean(x, axis=(2, 3))                        # (N, C)
    mx = jnp.max(x, axis=(2, 3))                          # (N, C)

    def fc(v):
        hh = v @ w1.T + b1[:, 0]
        hh = jnp.where(hh > 0, hh, 0.01 * hh)
        return hh @ w2.T + b2[:, 0]

    ch = jax.nn.sigmoid(fc(avg) + fc(mx))                 # (N, C)
    x = x * ch[:, :, None, None]
    avg_c = jnp.mean(x, axis=1, keepdims=True)
    max_c = jnp.max(x, axis=1, keepdims=True)
    att_in = jnp.concatenate([avg_c, max_c], axis=1)      # (N, 2, H, W)
    sp = jax.lax.conv_general_dilated(
        att_in, cw4, window_strides=(1, 1),
        padding=((PAD, PAD), (PAD, PAD)),
        dimension_numbers=("NCHW", "OIHW", "NCHW")) + cb.reshape(1, 1, 1, 1)
    sp = jax.nn.sigmoid(sp)
    return x * sp


if __name__ == "__main__":
    key = jax.random.PRNGKey(0)
    kx, k1, k2, k3, k4, k5, k6 = jax.random.split(key, 7)

    x = jax.random.normal(kx, (N, C, H, W), dtype=jnp.float32)

    # deterministic parameter init (shapes from the PyTorch module __init__)
    w1 = jax.random.normal(k1, (CR, C), dtype=jnp.float32) * 0.2   # Conv2d(C, C//8, 1)
    b1 = jax.random.normal(k2, (CR, 1), dtype=jnp.float32) * 0.1
    w2 = jax.random.normal(k3, (C, CR), dtype=jnp.float32) * 0.2   # Conv2d(C//8, C, 1)
    b2 = jax.random.normal(k4, (C, 1), dtype=jnp.float32) * 0.1
    cw4 = jax.random.normal(k5, (1, 2, KS, KS), dtype=jnp.float32) * 0.1  # Conv2d(2, 1, 7)
    cb = jax.random.normal(k6, (1,), dtype=jnp.float32) * 0.1

    cbam_fwd = make_cbam_pallas(w1, b1, w2, b2, cw4, cb, image_hw=(H, W))
    out = cbam_fwd(x)
    out = jax.block_until_ready(out)

    ref = cbam_reference(x, w1, b1, w2, b2, cw4, cb)
    err = float(jnp.max(jnp.abs(out - ref)))
    assert err < 1e-4, f"max abs error too large: {err}"

    print("KERNEL_OK")
</pallas_src>

<mosaic_0001>
module attributes {stable_mosaic.version = 11 : i64} {
  func.func @_cbam_kernel(%arg0: memref<2x16x256xf32, #tpu.memory_space<vmem>>, %arg1: memref<7x16xf32, #tpu.memory_space<vmem>>, %arg2: memref<512x256xf32, #tpu.memory_space<vmem>>, %arg3: memref<2x16x256xf32, #tpu.memory_space<vmem>>) attributes {dimension_semantics = [], scalar_prefetch = 0 : i64, scratch_operands = 0 : i64, tpu.core_type = #tpu.core_type<tc>} {
    %c0 = arith.constant 0 : index
    %c0_0 = arith.constant 0 : index
    %c0_1 = arith.constant 0 : index
    %0 = vector.load %arg0[%c0, %c0_0, %c0_1] : memref<2x16x256xf32, #tpu.memory_space<vmem>>, vector<2x16x256xf32>
    %cst = arith.constant dense<0.000000e+00> : vector<2x16xf32>
    %1 = vector.multi_reduction <add>, %0, %cst [2] : vector<2x16x256xf32> to vector<2x16xf32>
    %cst_2 = arith.constant 2.560000e+02 : f32
    %2 = vector.broadcast %cst_2 : f32 to vector<2x16xf32>
    %3 = arith.divf %1, %2 : vector<2x16xf32>
    %cst_3 = arith.constant dense<0xFF800000> : vector<2x16xf32>
    %4 = vector.multi_reduction <maximumf>, %0, %cst_3 [2] : vector<2x16x256xf32> to vector<2x16xf32>
    %5 = tpu.concatenate %3, %4 in 0 : vector<2x16xf32>, vector<2x16xf32> -> vector<4x16xf32>
    %c0_4 = arith.constant 0 : index
    %c0_5 = arith.constant 0 : index
    %6 = vector.load %arg1[%c0_4, %c0_5] : memref<7x16xf32, #tpu.memory_space<vmem>>, vector<2x16xf32>
    %c2 = arith.constant 2 : index
    %c0_6 = arith.constant 0 : index
    %7 = vector.load %arg1[%c2, %c0_6] : memref<7x16xf32, #tpu.memory_space<vmem>>, vector<1x2xf32>
    %c3 = arith.constant 3 : index
    %c0_7 = arith.constant 0 : index
    %8 = vector.load %arg1[%c3, %c0_7] : memref<7x16xf32, #tpu.memory_space<vmem>>, vector<2x16xf32>
    %c5 = arith.constant 5 : index
    %c0_8 = arith.constant 0 : index
    %9 = vector.load %arg1[%c5, %c0_8] : memref<7x16xf32, #tpu.memory_space<vmem>>, vector<1x16xf32>
    %c6 = arith.constant 6 : index
    %c0_9 = arith.constant 0 : index
    %10 = vector.load %arg1[%c6, %c0_9] : memref<7x16xf32, #tpu.memory_space<vmem>>, vector<1x1xf32>
    %11 = vector.shape_cast %5 : vector<4x16xf32> to vector<4x1x16xf32>
    %12 = vector.shape_cast %6 : vector<2x16xf32> to vector<1x2x16xf32>
    %13 = vector.broadcast %11 : vector<4x1x16xf32> to vector<4x2x16xf32>
    %14 = vector.broadcast %12 : vector<1x2x16xf32> to vector<4x2x16xf32>
    %15 = arith.mulf %13, %14 : vector<4x2x16xf32>
    %cst_10 = arith.constant dense<0.000000e+00> : vector<4x2xf32>
    %16 = vector.multi_reduction <add>, %15, %cst_10 [2] : vector<4x2x16xf32> to vector<4x2xf32>
    %17 = vector.broadcast %7 : vector<1x2xf32> to vector<4x2xf32>
    %18 = arith.addf %16, %17 : vector<4x2xf32>
    %cst_11 = arith.constant 0.000000e+00 : f32
    %19 = vector.broadcast %cst_11 : f32 to vector<4x2xf32>
    %20 = arith.cmpf ogt, %18, %19 : vector<4x2xf32>
    %cst_12 = arith.constant 0.00999999977 : f32
    %21 = vector.broadcast %cst_12 : f32 to vector<4x2xf32>
    %22 = arith.mulf %21, %18 : vector<4x2xf32>
    %23 = arith.select %20, %18, %22 : vector<4x2xi1>, vector<4x2xf32>
    %24 = vector.shape_cast %23 : vector<4x2xf32> to vector<4x2x1xf32>
    %25 = vector.shape_cast %8 : vector<2x16xf32> to vector<1x2x16xf32>
    %26 = vector.broadcast %24 : vector<4x2x1xf32> to vector<4x2x16xf32>
    %27 = vector.broadcast %25 : vector<1x2x16xf32> to vector<4x2x16xf32>
    %28 = arith.mulf %26, %27 : vector<4x2x16xf32>
    %cst_13 = arith.constant dense<0.000000e+00> : vector<4x16xf32>
    %29 = vector.multi_reduction <add>, %28, %cst_13 [1] : vector<4x2x16xf32> to vector<4x16xf32>
    %30 = vector.broadcast %9 : vector<1x16xf32> to vector<4x16xf32>
    %31 = arith.addf %29, %30 : vector<4x16xf32>
    %32 = vector.extract_strided_slice %31 {offsets = [0, 0], sizes = [2, 16], strides = [1, 1]} : vector<4x16xf32> to vector<2x16xf32>
    %33 = vector.extract_strided_slice %31 {offsets = [2, 0], sizes = [2, 16], strides = [1, 1]} : vector<4x16xf32> to vector<2x16xf32>
    %34 = arith.addf %32, %33 : vector<2x16xf32>
    %35 = arith.negf %34 : vector<2x16xf32>
    %36 = math.exp %35 : vector<2x16xf32>
    %cst_14 = arith.constant 1.000000e+00 : f32
    %37 = vector.broadcast %cst_14 : f32 to vector<2x16xf32>
    %38 = arith.addf %37, %36 : vector<2x16xf32>
    %39 = arith.divf %37, %38 : vector<2x16xf32>
    %40 = vector.shape_cast %39 : vector<2x16xf32> to vector<2x16x1xf32>
    %41 = vector.broadcast %40 : vector<2x16x1xf32> to vector<2x16x256xf32>
    %42 = arith.mulf %0, %41 : vector<2x16x256xf32>
    %cst_15 = arith.constant dense<0.000000e+00> : vector<2x256xf32>
    %43 = vector.multi_reduction <add>, %42, %cst_15 [1] : vector<2x16x256xf32> to vector<2x256xf32>
    %cst_16 = arith.constant 1.600000e+01 : f32
    %44 = vector.broadcast %cst_16 : f32 to vector<2x256xf32>
    %45 = arith.divf %43, %44 : vector<2x256xf32>
    %cst_17 = arith.constant dense<0xFF800000> : vector<2x256xf32>
    %46 = vector.multi_reduction <maximumf>, %42, %cst_17 [1] : vector<2x16x256xf32> to vector<2x256xf32>
    %47 = tpu.concatenate %45, %46 in 1 : vector<2x256xf32>, vector<2x256xf32> -> vector<2x512xf32>
    %c0_18 = arith.constant 0 : index
    %c0_19 = arith.constant 0 : index
    %48 = vector.load %arg2[%c0_18, %c0_19] : memref<512x256xf32, #tpu.memory_space<vmem>>, vector<512x256xf32>
    %cst_20 = arith.constant dense<0.000000e+00> : vector<2x256xf32>
    %49 = tpu.matmul %47, %48, %cst_20 {dimension_numbers = #tpu.dot_dimension_numbers<[1], [0], [0], [1], [0, 0, 1, 1], [], []>} : vector<2x512xf32>, vector<512x256xf32>, vector<2x256xf32> -> vector<2x256xf32>
    %50 = vector.broadcast %10 : vector<1x1xf32> to vector<2x256xf32>
    %51 = arith.addf %49, %50 : vector<2x256xf32>
    %52 = arith.negf %51 : vector<2x256xf32>
    %53 = math.exp %52 : vector<2x256xf32>
    %cst_21 = arith.constant 1.000000e+00 : f32
    %54 = vector.broadcast %cst_21 : f32 to vector<2x256xf32>
    %55 = arith.addf %54, %53 : vector<2x256xf32>
    %56 = arith.divf %54, %55 : vector<2x256xf32>
    %57 = vector.shape_cast %56 : vector<2x256xf32> to vector<2x1x256xf32>
    %58 = vector.broadcast %57 : vector<2x1x256xf32> to vector<2x16x256xf32>
    %59 = arith.mulf %42, %58 : vector<2x16x256xf32>
    %c0_22 = arith.constant 0 : index
    %c0_23 = arith.constant 0 : index
    %c0_24 = arith.constant 0 : index
    %60 = vector.load %arg3[%c0_22, %c0_23, %c0_24] : memref<2x16x256xf32, #tpu.memory_space<vmem>>, vector<2x16x256xf32>
    tpu.vector_store %arg3[%c0_22, %c0_23, %c0_24], %59 {strides = array<i32>} : memref<2x16x256xf32, #tpu.memory_space<vmem>>, vector<2x16x256xf32>,
    return
  }
}

</mosaic_0001>

<bundles_post_ra>
// kernel: fwd.1
= control target key start
LH: loop header
LB: loop body
LE: loop exit
PB: predicated region body
PF: predicated region fallthrough
CT: control target
= control target key end

     0   :  { %8 = vsyncpa [#allocation3], 0  ;;  %s799_s12 = smov [#allocation2]   ;;  %s1012_s0 = inlined_call_operand.vmem [shape: f32[2,16,256], index: 0, kind: input, shape index: {}]   ;;  %s1013_s1 = inlined_call_operand.vmem [shape: f32[7,16], index: 1, kind: input, shape index: {}]   ;;  %s1014_s2 = inlined_call_operand.hbm [shape: f32[512,256], index: 2, kind: input, shape index: {}]   ;;  %s1015_s3 = inlined_call_operand.vmem [shape: f32[2,16,256], index: 3, kind: output, shape index: {}]  }
   0x1   :  { %s18_s13 = sshll.u32 %s799_s12, 4  ;;  %s19_s13 = int_to_ptr.vmem [resolvable:$true] %s18_s13 }
   0x2   :  { %s785_s14 = scalar_lea.vmem %s19_s13, 16384  ;;  %p790_p1 = scmp.lt.s32.totalorder %s19_s13, %s19_s13 }
   0x3   :  { %p786_p0 = scmp.ne.s32.totalorder %s19_s13, %s785_s14  ;;  %p791_p2 = scmp.lt.s32.totalorder %s785_s14, %s785_s14 }
   0x5   :  { %p792_p3 = por %p791_p2, %p790_p1 }
   0x7   :  { %p793_p4 = pnand %p792_p3, %p786_p0 }
   0x9   :  { %796 = shalt.err (!%p793_p4)
}
   0xa   :  { %s800_s15 = smov 256   ;;  %s801_s16 = smov 16  }
   0xb   :  { %24 = dma.hbm_to_vmem [thread:$0]  %s1014_s2, 16384, %s19_s13, [#allocation3], %s800_s15, %s800_s15, %s801_s16  }
   0xc   :  { %797 = dma.done.wait [#allocation3], 16384  }
   0xd   :  { %798 = vsyncadd [#allocation3], 4294950912  ;;  %v830_v0 = vld [vmem:[%s1012_s0 + $0x20] sm:$0xff]  ;;  %v835_v1 = vld [vmem:[%s1012_s0 + $0x28] sm:$0xff]  ;;  %v69_v16 = vlaneseq  ;;  %v802_v27 = vmov 1966171168  }
   0xe   :  { %v840_v2 = vld [vmem:[%s1012_s0] sm:$0xff]  ;;  %v42_v3 = vadd.f32 %v835_v1, %v830_v0  ;;  %v847_v4 = vld [vmem:[%s1012_s0 + $0x8] sm:$0xff]  ;;  %v852_v5 = vld [vmem:[%s1012_s0 + $0x30] sm:$0xff]  ;;  %v59_v15 = vmax.f32 %v830_v0, %v835_v1  ;;  %v128_v28 = vunpack.c.l.s4 %v802_v27  ;;  %vm80_vm0 = vcmask 130112  }
   0xf   :  { %v857_v6 = vld [vmem:[%s1012_s0 + $0x38] sm:$0xff]  ;;  %v36_v7 = vadd.f32 %v847_v4, %v840_v2  ;;  %v864_v8 = vld [vmem:[%s1012_s0 + $0x10] sm:$0xff]  ;;  %v53_v13 = vmax.f32 %v840_v2, %v847_v4  ;;  %v70_v17 = vand.u32 127, %v69_v16  ;;  %v883_v21 = vshrl.u32 %v69_v16, 7  ;;  %v121_v57 = vld [vmem:[%s1013_s1] sm:$0x3] }
  0x10   :  { %v869_v9 = vld [vmem:[%s1012_s0 + $0x18] sm:$0xff]  ;;  %43 = vadd.xlane.f32.xlu1 %v42_v3  ;;  %v45_v10 = vadd.f32 %v857_v6, %v852_v5  ;;  %v62_v14 = vmax.f32 %v852_v5, %v857_v6  ;;  %v129_v36 = vunpack.c.0.s8 %v128_v28  ;;  %vm91_vm1 = vcmask 1041409  }
  0x11   :  { %37 = vadd.xlane.f32.xlu0 %v36_v7  ;;  %v39_v11 = vadd.f32 %v869_v9, %v864_v8  ;;  %v56_v12 = vmax.f32 %v864_v8, %v869_v9  ;;  %v75_v20 = vadd.s32 4294967288, %v70_v17  ;;  %v73_v29 = vsub.s32 %v70_v17, %v883_v21 }
  0x12   :  { %vm116_vm2 = vcmask 1043459   ;;  %vm119_vm3 = vcmask 1041408   ;;  %v890_v47 = vsub.s32 %v129_v36, %v883_v21  ;;  %v896_v53 = vsub.s32 0, %v883_v21 }
  0x13   :  { %v78_v24 = vsub.s32 %v75_v20, %v883_v21  ;;  %vm175_vm4 = vcmask 123904   ;;  %v803_v17 = vmov 0  }
  0x14   :  { %46 = vadd.xlane.f32.xlu1 %v45_v10  ;;  %760 = vset.pattern.permute.xlu0 %v803_v17 }
  0x15   :  { %40 = vadd.xlane.f32.xlu0 %v39_v11  ;;  %759 = vset.pattern.permute.xlu1 %v803_v17  ;;  %v472_v17 = vld [vmem:[#allocation2 + $0x270] sm:$0xff] }
  0x18   :  { %57 = vmax.xlane.f32.xlu1 %v56_v12 }
  0x19   :  { %54 = vmax.xlane.f32.xlu0 %v53_v13 }
  0x1c   :  { %63 = vmax.xlane.f32.xlu1 %v62_v14 }
  0x1d   :  { %60 = vmax.xlane.f32.xlu0 %v59_v15 }
  0x99   :  { %v44_v18 = vpop.xlane.xlu1 %43 }
  0x9a   :  { %v38_v19 = vpop.xlane.xlu0 %37  ;;  %v51_v30 = vmul.f32 0.00390625, %v44_v18  ;;  %v746_v18 = vld [vmem:[%s1013_s1 + $0x2] ss:$0 sm:$0xff] }
  0x9b   :  { %v49_v31 = vmul.f32 0.00390625, %v38_v19 }
  0x9c   :  { %v85_v37 = vrot.slane %v51_v30, %v73_v29 }
  0x9d   :  { %v47_v22 = vpop.xlane.xlu1 %46  ;;  %v74_v38 = vrot.slane %v49_v31, %v73_v29 }
  0x9e   :  { %v41_v23 = vpop.xlane.xlu0 %40  ;;  %v52_v25 = vmul.f32 0.00390625, %v47_v22 }
  0x9f   :  { %v50_v26 = vmul.f32 0.00390625, %v41_v23 }
  0xa0   :  { %v89_v34 = vrot.slane %v52_v25, %v78_v24 }
  0xa1   :  { %v58_v32 = vpop.xlane.xlu1 %57  ;;  %v79_v35 = vrot.slane %v50_v26, %v78_v24 }
  0xa2   :  { %v55_v33 = vpop.xlane.xlu0 %54  ;;  %v105_v39 = vrot.slane %v58_v32, %v78_v24  ;;  %v90_v44 = vsel %vm80_vm0, %v89_v34, %v85_v37  ;;  %v489_v37 = vld [vmem:[#allocation2 + $0x2f8] sm:$0xff] }
  0xa3   :  { %v101_v40 = vrot.slane %v55_v33, %v73_v29  ;;  %v81_v45 = vsel %vm80_vm0, %v79_v35, %v74_v38  ;;  %v488_v38 = vld [vmem:[#allocation2 + $0x2f0] sm:$0xff]  ;;  %597 = vmatprep.subr.mxu1 %v489_v37  ;;  %v399_v37 = vld [vmem:[#allocation2 + $0x28] sm:$0xff] }
  0xa4   :  { %v92_v50 = vsel %vm91_vm1, %v90_v44, %v81_v45  ;;  %598 = vmatpush1.msra.mxu1 %v488_v38  ;;  %v485_v44 = vld [vmem:[#allocation2 + $0x2d8] sm:$0xff]  ;;  %v422_v45 = vld [vmem:[#allocation2 + $0xe0] sm:$0xff] }
  0xa5   :  { %v64_v41 = vpop.xlane.xlu1 %63  ;;  %v106_v48 = vsel %vm80_vm0, %v105_v39, %v101_v40  ;;  %v425_v39 = vld [vmem:[#allocation2 + $0xf8] sm:$0xff]  ;;  %v487_v40 = vld [vmem:[#allocation2 + $0x2e8] sm:$0xff]  ;;  %v462_v38 = vld [vmem:[#allocation2 + $0x220] sm:$0xff] }
  0xa6   :  { %v114_v42 = vrot.slane %v64_v41, %v78_v24  ;;  %v61_v43 = vpop.xlane.xlu0 %60  ;;  %526 = vmatprep.subr.mxu0 %v425_v39  ;;  %v424_v41 = vld [vmem:[#allocation2 + $0xf0] sm:$0xff]  ;;  %599 = vmatprep.subr.mxu1 %v487_v40  ;;  %v398_v39 = vld [vmem:[#allocation2 + $0x20] sm:$0xff]  ;;  %v461_v40 = vld [vmem:[#allocation2 + $0x218] sm:$0xff] }
  0xa7   :  { %v110_v46 = vrot.slane %v61_v43, %v73_v29  ;;  %527 = vmatpush1.msra.mxu0 %v424_v41  ;;  %v423_v43 = vld [vmem:[#allocation2 + $0xe8] sm:$0xff]  ;;  %v397_v41 = vld [vmem:[#allocation2 + $0x18] sm:$0xff] }
  0xa8   :  { %528 = vmatprep.subr.mxu0 %v423_v43  ;;  %v396_v43 = vld [vmem:[#allocation2 + $0x10] sm:$0xff] }
  0xa9   :  { %v115_v49 = vsel %vm80_vm0, %v114_v42, %v110_v46  ;;  %v486_v42 = vld [vmem:[#allocation2 + $0x2e0] sm:$0xff]  ;;  %v484_v46 = vld [vmem:[#allocation2 + $0x2d0] sm:$0xff]  ;;  %529 = vmatpush1.msra.mxu0 %v422_v45  ;;  %v395_v45 = vld [vmem:[#allocation2 + $0x8] sm:$0xff] }
  0xaa   :  { %v117_v51 = vsel %vm116_vm2, %v115_v49, %v106_v48  ;;  %v421_v48 = vld [vmem:[#allocation2 + $0xd8] sm:$0xff]  ;;  %600 = vmatpush1.msra.mxu1 %v486_v42  ;;  %v483_v49 = vld [vmem:[#allocation2 + $0x2c8] sm:$0xff]  ;;  %v460_v42 = vld [vmem:[#allocation2 + $0x210] sm:$0xff] }
  0xab   :  { %v120_v52 = vsel %vm119_vm3, %v92_v50, %v117_v51  ;;  %v420_v50 = vld [vmem:[#allocation2 + $0xd0] sm:$0xff]  ;;  %v419_v51 = vld [vmem:[#allocation2 + $0xc8] sm:$0xff]  ;;  %601 = vmatprep.subr.mxu1 %v485_v44  ;;  %530 = vmatprep.subr.mxu0 %v421_v48  ;;  %v394_v48 = vld [vmem:[#allocation2] sm:$0xff] }
  0xac   :  { %v133_v54 = vrot.slane %v120_v52, %v890_v47  ;;  %v482_v52 = vld [vmem:[#allocation2 + $0x2c0] sm:$0xff]  ;;  %602 = vmatpush1.msra.mxu1 %v484_v46  ;;  %531 = vmatpush1.msra.mxu0 %v420_v50  ;;  %v459_v44 = vld [vmem:[#allocation2 + $0x208] sm:$0xff]  ;;  %v520_v50 = vld [vmem:[#allocation2 + $0x3f0] sm:$0xff] }
  0xad   :  { %603 = vmatprep.subr.mxu1 %v483_v49  ;;  %532 = vmatprep.subr.mxu0 %v419_v51  ;;  %v458_v46 = vld [vmem:[#allocation2 + $0x200] sm:$0xff]  ;;  %v521_v49 = vld [vmem:[#allocation2 + $0x3f8] sm:$0xff] }
  0xae   :  { %v141_v55 = vrot.slane %v133_v54, %v890_v47  ;;  %v134_v56 = vcombine.high %v133_v54, %v133_v54  ;;  %v418_v54 = vld [vmem:[#allocation2 + $0xc0] sm:$0xff]  ;;  %604 = vmatpush1.msra.mxu1 %v482_v52 }
  0xaf   :  { %533 = vmatpush1.msra.mxu0 %v418_v54  ;;  %v123_v51 = vld [vmem:[%s1013_s1 + $0x3] sm:$0x3] }
  0xb0   :  { %v154_v58 = vrot.slane %v141_v55, %v896_v53  ;;  %v148_v59 = vrot.slane %v134_v56, %v890_v47  ;;  %v149_v60 = vcombine.high %v141_v55, %v141_v55  ;;  %v481_v55 = vld [vmem:[#allocation2 + $0x2b8] sm:$0xff] }
  0xb1   :  { %v417_v56 = vld [vmem:[#allocation2 + $0xb8] sm:$0xff]  ;;  %605 = vmatprep.subr.mxu1 %v481_v55 }
  0xb2   :  { %v171_v61 = vmul.f32 %v154_v58, %v121_v57  ;;  %v158_v62 = vrot.slane %v148_v59, %v896_v53  ;;  %v162_v63 = vrot.slane %v149_v60, %v896_v53  ;;  %v150_v3 = vcombine.high %v148_v59, %v148_v59  ;;  %v416_v58 = vld [vmem:[#allocation2 + $0xb0] sm:$0xff]  ;;  %v479_v59 = vld [vmem:[#allocation2 + $0x2a8] sm:$0xff]  ;;  %534 = vmatprep.subr.mxu0 %v417_v56 }
  0xb3   :  { %v415_v60 = vld [vmem:[#allocation2 + $0xa8] sm:$0xff]  ;;  %535 = vmatpush1.msra.mxu0 %v416_v58 }
  0xb4   :  { %v176_v7 = vsel %vm175_vm4, %v171_v61, 0.0  ;;  %v172_v10 = vmul.f32 %v158_v62, %v121_v57  ;;  %v173_v11 = vmul.f32 %v162_v63, %v121_v57  ;;  %v166_v12 = vrot.slane %v150_v3, %v896_v53  ;;  %v478_v61 = vld [vmem:[#allocation2 + $0x2a0] sm:$0xff]  ;;  %v477_v63 = vld [vmem:[#allocation2 + $0x298] sm:$0xff]  ;;  %536 = vmatprep.subr.mxu0 %v415_v60 }
  0xb5   :  { %177 = vadd.xlane.f32.xlu0 %v176_v7  ;;  %v414_v62 = vld [vmem:[#allocation2 + $0xa0] sm:$0xff]  ;;  %v413_v3 = vld [vmem:[#allocation2 + $0x98] sm:$0xff]  ;;  %v476_v7 = vld [vmem:[#allocation2 + $0x290] sm:$0xff] }
  0xb6   :  { %v179_v13 = vsel %vm175_vm4, %v172_v10, 0.0  ;;  %v174_v14 = vmul.f32 %v166_v12, %v121_v57  ;;  %v182_v15 = vsel %vm175_vm4, %v173_v11, 0.0  ;;  %v480_v57 = vld [vmem:[#allocation2 + $0x2b0] sm:$0xff]  ;;  %537 = vmatpush1.msra.mxu0 %v414_v62  ;;  %v475_v11 = vld [vmem:[#allocation2 + $0x288] sm:$0xff] }
  0xb7   :  { %180 = vadd.xlane.f32.xlu1 %v179_v13  ;;  %606 = vmatpush1.msra.mxu1 %v480_v57  ;;  %v412_v10 = vld [vmem:[#allocation2 + $0x90] sm:$0xff]  ;;  %v411_v12 = vld [vmem:[#allocation2 + $0x88] sm:$0xff]  ;;  %v474_v13 = vld [vmem:[#allocation2 + $0x280] sm:$0xff] }
  0xb8   :  { %v185_v16 = vsel %vm175_vm4, %v174_v14, 0.0  ;;  %607 = vmatprep.subr.mxu1 %v479_v59  ;;  %538 = vmatprep.subr.mxu0 %v413_v3  ;;  %v410_v14 = vld [vmem:[#allocation2 + $0x80] sm:$0xff] }
  0xb9   :  { %183 = vadd.xlane.f32.xlu0 %v182_v15  ;;  %608 = vmatpush1.msra.mxu1 %v478_v61  ;;  %v473_v15 = vld [vmem:[#allocation2 + $0x278] sm:$0xff] }
  0xba   :  { %609 = vmatprep.subr.mxu1 %v477_v63  ;;  %539 = vmatpush1.msra.mxu0 %v412_v10 }
  0xbb   :  { %186 = vadd.xlane.f32.xlu1 %v185_v16  ;;  %610 = vmatpush1.msra.mxu1 %v476_v7  ;;  %v409_v16 = vld [vmem:[#allocation2 + $0x78] sm:$0xff] }
  0xbc   :  { %611 = vmatprep.subr.mxu1 %v475_v11  ;;  %540 = vmatprep.subr.mxu0 %v411_v12 }
  0xbd   :  { %612 = vmatpush1.msra.mxu1 %v474_v13  ;;  %541 = vmatpush1.msra.mxu0 %v410_v14 }
  0xbe   :  { %613 = vmatprep.subr.mxu1 %v473_v15  ;;  %542 = vmatprep.subr.mxu0 %v409_v16 }
  0xbf   :  { %614 = vmatpush1.msra.mxu1 %v472_v17 }
  0xcf   :  { %194 = vbcast.lane.b32.xlu0 %v746_v18, 256  ;;  %v408_v18 = vld [vmem:[#allocation2 + $0x70] sm:$0xff] }
  0xd0   :  { %543 = vmatpush1.msra.mxu0 %v408_v18 }
 0x13e   :  { %v178_v19 = vpop.xlane.xlu0 %177 }
 0x140   :  { %v181_v20 = vpop.xlane.xlu1 %180 }
 0x142   :  { %v184_v22 = vpop.xlane.xlu0 %183 }
 0x144   :  { %v187_v23 = vpop.xlane.xlu1 %186 }
 0x146   :  { %v195_v24 = vpop.permute.xlu0 %194 }
 0x147   :  { %v197_v25 = vadd.f32 %v195_v24, %v178_v19  ;;  %v198_v26 = vadd.f32 %v195_v24, %v181_v20  ;;  %v200_v27 = vadd.f32 %v195_v24, %v187_v23  ;;  %v199_v30 = vadd.f32 %v195_v24, %v184_v22  ;;  %v471_v19 = vld [vmem:[#allocation2 + $0x268] sm:$0xff]  ;;  %v470_v22 = vld [vmem:[#allocation2 + $0x260] sm:$0xff]  ;;  %v469_v24 = vld [vmem:[#allocation2 + $0x258] sm:$0xff] }
 0x148   :  { %v407_v20 = vld [vmem:[#allocation2 + $0x68] sm:$0xff]  ;;  %v406_v23 = vld [vmem:[#allocation2 + $0x60] sm:$0xff]  ;;  %615 = vmatprep.subr.mxu1 %v471_v19 }
 0x149   :  { %vm201_vm5 = vcmp.gt.f32.partialorder %v197_v25, 0.0  ;;  %v205_v28 = vmul.f32 0.01, %v197_v25  ;;  %vm204_vm6 = vcmp.gt.f32.partialorder %v200_v27, 0.0  ;;  %v208_v29 = vmul.f32 0.01, %v200_v27  ;;  %544 = vmatprep.subr.mxu0 %v407_v20  ;;  %616 = vmatpush1.msra.mxu1 %v470_v22 }
 0x14a   :  { %v206_v33 = vmul.f32 0.01, %v198_v26  ;;  %vm202_vm7 = vcmp.gt.f32.partialorder %v198_v26, 0.0  ;;  %v207_v35 = vmul.f32 0.01, %v199_v30  ;;  %vm203_vm8 = vcmp.gt.f32.partialorder %v199_v30, 0.0  ;;  %545 = vmatpush1.msra.mxu0 %v406_v23  ;;  %617 = vmatprep.subr.mxu1 %v469_v24 }
 0x14b   :  { %v209_v31 = vsel %vm201_vm5, %v197_v25, %v205_v28  ;;  %v212_v32 = vsel %vm204_vm6, %v200_v27, %v208_v29  ;;  %v405_v25 = vld [vmem:[#allocation2 + $0x58] sm:$0xff]  ;;  %v404_v27 = vld [vmem:[#allocation2 + $0x50] sm:$0xff]  ;;  %v467_v28 = vld [vmem:[#allocation2 + $0x248] sm:$0xff] }
 0x14c   :  { %215 = vperm.xlu1 %759, %v209_v31   ;;  %230 = vperm.xlu0 %760, %v212_v32   ;;  %v210_v34 = vsel %vm202_vm7, %v198_v26, %v206_v33  ;;  %v211_v36 = vsel %vm203_vm8, %v199_v30, %v207_v35  ;;  %v468_v26 = vld [vmem:[#allocation2 + $0x250] sm:$0xff]  ;;  %v403_v29 = vld [vmem:[#allocation2 + $0x48] sm:$0xff]  ;;  %v466_v30 = vld [vmem:[#allocation2 + $0x240] sm:$0xff] }
 0x14d   :  { %546 = vmatprep.subr.mxu0 %v405_v25  ;;  %v402_v31 = vld [vmem:[#allocation2 + $0x40] sm:$0xff]  ;;  %618 = vmatpush1.msra.mxu1 %v468_v26  ;;  %v465_v32 = vld [vmem:[#allocation2 + $0x238] sm:$0xff]  ;;  %v400_v35 = vld [vmem:[#allocation2 + $0x30] sm:$0xff] }
 0x14e   :  { %547 = vmatpush1.msra.mxu0 %v404_v27  ;;  %v401_v33 = vld [vmem:[#allocation2 + $0x38] sm:$0xff]  ;;  %619 = vmatprep.subr.mxu1 %v467_v28 }
 0x14f   :  { %548 = vmatprep.subr.mxu0 %v403_v29  ;;  %620 = vmatpush1.msra.mxu1 %v466_v30  ;;  %v747_v29 = vld [vmem:[%s1013_s1 + $0x5] ss:$0 sm:$0xff] }
 0x150   :  { %220 = vperm.xlu1 %759, %v210_v34   ;;  %v464_v34 = vld [vmem:[#allocation2 + $0x230] sm:$0xff]  ;;  %549 = vmatpush1.msra.mxu0 %v402_v31 }
 0x151   :  { %621 = vmatprep.subr.mxu1 %v465_v32  ;;  %550 = vmatprep.subr.mxu0 %v401_v33 }
 0x152   :  { %622 = vmatpush1.msra.mxu1 %v464_v34  ;;  %551 = vmatpush1.msra.mxu0 %v400_v35 }
 0x153   :  { %552 = vmatprep.subr.mxu0 %v399_v37 }
 0x154   :  { %225 = vperm.xlu1 %759, %v211_v36   ;;  %v463_v36 = vld [vmem:[#allocation2 + $0x228] sm:$0xff]  ;;  %553 = vmatpush1.msra.mxu0 %v398_v39 }
 0x155   :  { %623 = vmatprep.subr.mxu1 %v463_v36  ;;  %554 = vmatprep.subr.mxu0 %v397_v41 }
 0x156   :  { %624 = vmatpush1.msra.mxu1 %v462_v38  ;;  %555 = vmatpush1.msra.mxu0 %v396_v43 }
 0x157   :  { %625 = vmatprep.subr.mxu1 %v461_v40  ;;  %556 = vmatprep.subr.mxu0 %v395_v45 }
 0x158   :  { %626 = vmatpush1.msra.mxu1 %v460_v42  ;;  %557 = vmatpush1.msra.mxu0 %v394_v48  ;;  %v457_v48 = vld [vmem:[#allocation2 + $0x1f8] sm:$0xff] }
 0x159   :  { %627 = vmatprep.subr.mxu1 %v459_v44  ;;  %558 = vmatprep.subr.mxu0 %v457_v48  ;;  %v495_v48 = vld [vmem:[#allocation2 + $0x328] sm:$0xff] }
 0x15a   :  { %628 = vmatpush1.msra.mxu1 %v458_v46 }
 0x15b   :  { %629 = vmatprep.subr.mxu1 %v521_v49  ;;  %v519_v49 = vld [vmem:[#allocation2 + $0x3e8] sm:$0xff] }
 0x15c   :  { %630 = vmatpush2.msra.mxu1 %v520_v50  ;;  %v456_v50 = vld [vmem:[#allocation2 + $0x1f0] sm:$0xff] }
 0x15d   :  { %631 = vmatprep.subr.mxu1 %v519_v49  ;;  %559 = vmatpush2.msra.mxu0 %v456_v50  ;;  %v432_v49 = vld [vmem:[#allocation2 + $0x130] sm:$0xff]  ;;  %v494_v50 = vld [vmem:[#allocation2 + $0x320] sm:$0xff] }
 0x1c7   :  { %v231_v52 = vpop.permute.xlu0 %230  ;;  %v216_v54 = vpop.permute.xlu1 %215 }
 0x1c8   :  { %v236_v55 = vmul.f32 %v231_v52, %v123_v51  ;;  %v233_v56 = vmul.f32 %v216_v54, %v123_v51  ;;  %v455_v52 = vld [vmem:[#allocation2 + $0x1e8] sm:$0xff]  ;;  %v517_v54 = vld [vmem:[#allocation2 + $0x3d8] sm:$0xff] }
 0x1c9   :  { %560 = vmatprep.subr.mxu0 %v455_v52  ;;  %v493_v52 = vld [vmem:[#allocation2 + $0x318] sm:$0xff] }
 0x1ca   :  { %v258_v57 = vsel %vm175_vm4, %v236_v55, 0.0  ;;  %v237_v58 = vsel %vm175_vm4, %v233_v56, 0.0  ;;  %v454_v55 = vld [vmem:[#allocation2 + $0x1e0] sm:$0xff]  ;;  %v516_v56 = vld [vmem:[#allocation2 + $0x3d0] sm:$0xff] }
 0x1cb   :  { %v259_v59 = vrot.slane %v258_v57, 4  ;;  %v238_v60 = vrot.slane %v237_v58, 4  ;;  %v221_v61 = vpop.permute.xlu1 %220  ;;  %561 = vmatpush2.msra.mxu0 %v454_v55  ;;  %v492_v55 = vld [vmem:[#allocation2 + $0x310] sm:$0xff] }
 0x1cc   :  { %v234_v62 = vmul.f32 %v221_v61, %v123_v51  ;;  %v451_v61 = vld [vmem:[#allocation2 + $0x1c8] sm:$0xff] }
 0x1cd   :  { %v260_v63 = vadd.f32 %v259_v59, %v258_v57  ;;  %v239_v3 = vadd.f32 %v238_v60, %v237_v58  ;;  %v453_v57 = vld [vmem:[#allocation2 + $0x1d8] sm:$0xff]  ;;  %v515_v58 = vld [vmem:[#allocation2 + $0x3c8] sm:$0xff]  ;;  %v452_v59 = vld [vmem:[#allocation2 + $0x1d0] sm:$0xff] }
 0x1ce   :  { %v244_v7 = vsel %vm175_vm4, %v234_v62, 0.0  ;;  %562 = vmatprep.subr.mxu0 %v453_v57  ;;  %v514_v60 = vld [vmem:[#allocation2 + $0x3c0] sm:$0xff]  ;;  %v513_v62 = vld [vmem:[#allocation2 + $0x3b8] sm:$0xff]  ;;  %v491_v57 = vld [vmem:[#allocation2 + $0x308] sm:$0xff] }
 0x1cf   :  { %v261_v10 = vrot.slane %v260_v63, 2  ;;  %v240_v11 = vrot.slane %v239_v3, 2  ;;  %v245_v12 = vrot.slane %v244_v7, 4  ;;  %v226_v13 = vpop.permute.xlu1 %225  ;;  %563 = vmatpush2.msra.mxu0 %v452_v59  ;;  %v490_v59 = vld [vmem:[#allocation2 + $0x300] sm:$0xff] }
 0x1d0   :  { %v235_v14 = vmul.f32 %v226_v13, %v123_v51  ;;  %v518_v51 = vld [vmem:[#allocation2 + $0x3e0] sm:$0xff]  ;;  %564 = vmatprep.subr.mxu0 %v451_v61 }
 0x1d1   :  { %v262_v15 = vadd.f32 %v261_v10, %v260_v63  ;;  %v246_v16 = vadd.f32 %v245_v12, %v244_v7  ;;  %v241_v19 = vadd.f32 %v240_v11, %v239_v3  ;;  %632 = vmatpush2.msra.mxu1 %v518_v51  ;;  %v450_v63 = vld [vmem:[#allocation2 + $0x1c0] sm:$0xff]  ;;  %v512_v3 = vld [vmem:[#allocation2 + $0x3b0] sm:$0xff]  ;;  %v449_v7 = vld [vmem:[#allocation2 + $0x1b8] sm:$0xff] }
 0x1d2   :  { %v251_v17 = vsel %vm175_vm4, %v235_v14, 0.0  ;;  %633 = vmatprep.subr.mxu1 %v517_v54  ;;  %565 = vmatpush2.msra.mxu0 %v450_v63  ;;  %v511_v10 = vld [vmem:[#allocation2 + $0x3a8] sm:$0xff]  ;;  %v448_v11 = vld [vmem:[#allocation2 + $0x1b0] sm:$0xff]  ;;  %v510_v12 = vld [vmem:[#allocation2 + $0x3a0] sm:$0xff] }
 0x1d3   :  { %v263_v18 = vrot.slane %v262_v15, 1  ;;  %v247_v20 = vrot.slane %v246_v16, 2  ;;  %v252_v22 = vrot.slane %v251_v17, 4  ;;  %v242_v26 = vrot.slane %v241_v19, 1  ;;  %634 = vmatpush2.msra.mxu1 %v516_v56  ;;  %566 = vmatprep.subr.mxu0 %v449_v7  ;;  %v447_v14 = vld [vmem:[#allocation2 + $0x1a8] sm:$0xff]  ;;  %v430_v54 = vld [vmem:[#allocation2 + $0x120] sm:$0xff] }
 0x1d4   :  { %635 = vmatprep.subr.mxu1 %v515_v58  ;;  %567 = vmatpush2.msra.mxu0 %v448_v11  ;;  %v431_v51 = vld [vmem:[#allocation2 + $0x128] sm:$0xff]  ;;  %v429_v56 = vld [vmem:[#allocation2 + $0x118] sm:$0xff]  ;;  %v428_v58 = vld [vmem:[#allocation2 + $0x110] sm:$0xff] }
 0x1d5   :  { %v248_v23 = vadd.f32 %v247_v20, %v246_v16  ;;  %v253_v24 = vadd.f32 %v252_v22, %v251_v17  ;;  %v264_v25 = vadd.f32 %v263_v18, %v262_v15  ;;  %v243_v33 = vadd.f32 %v242_v26, %v241_v19  ;;  %636 = vmatpush2.msra.mxu1 %v514_v60  ;;  %v509_v15 = vld [vmem:[#allocation2 + $0x398] sm:$0xff]  ;;  %v446_v17 = vld [vmem:[#allocation2 + $0x1a0] sm:$0xff]  ;;  %v508_v18 = vld [vmem:[#allocation2 + $0x390] sm:$0xff] }
 0x1d6   :  { %637 = vmatprep.subr.mxu1 %v513_v62  ;;  %568 = vmatprep.subr.mxu0 %v447_v14  ;;  %v445_v19 = vld [vmem:[#allocation2 + $0x198] sm:$0xff]  ;;  %v507_v20 = vld [vmem:[#allocation2 + $0x388] sm:$0xff]  ;;  %v444_v22 = vld [vmem:[#allocation2 + $0x190] sm:$0xff] }
 0x1d7   :  { %v249_v27 = vrot.slane %v248_v23, 1  ;;  %v254_v28 = vrot.slane %v253_v24, 2  ;;  %v272_v32 = vadd.f32 %v747_v29, %v264_v25  ;;  %v269_v38 = vadd.f32 %v747_v29, %v243_v33  ;;  %638 = vmatpush2.msra.mxu1 %v512_v3  ;;  %569 = vmatpush2.msra.mxu0 %v446_v17  ;;  %v443_v25 = vld [vmem:[#allocation2 + $0x188] sm:$0xff]  ;;  %v505_v26 = vld [vmem:[#allocation2 + $0x378] sm:$0xff]  ;;  %v502_v33 = vld [vmem:[#allocation2 + $0x360] sm:$0xff] }
 0x1d8   :  { %639 = vmatprep.subr.mxu1 %v511_v10  ;;  %570 = vmatprep.subr.mxu0 %v445_v19  ;;  %v427_v60 = vld [vmem:[#allocation2 + $0x108] sm:$0xff]  ;;  %v426_v61 = vld [vmem:[#allocation2 + $0x100] sm:$0xff] }
 0x1d9   :  { %v250_v30 = vadd.f32 %v249_v27, %v248_v23  ;;  %v255_v31 = vadd.f32 %v254_v28, %v253_v24  ;;  %640 = vmatpush2.msra.mxu1 %v510_v12  ;;  %v506_v23 = vld [vmem:[#allocation2 + $0x380] sm:$0xff]  ;;  %571 = vmatpush2.msra.mxu0 %v444_v22 }
 0x1da   :  { %641 = vmatprep.subr.mxu1 %v509_v15  ;;  %572 = vmatprep.subr.mxu0 %v443_v25  ;;  %v442_v28 = vld [vmem:[#allocation2 + $0x180] sm:$0xff] }
 0x1db   :  { %v270_v34 = vadd.f32 %v747_v29, %v250_v30  ;;  %v256_v35 = vrot.slane %v255_v31, 1  ;;  %642 = vmatpush2.msra.mxu1 %v508_v18  ;;  %573 = vmatpush2.msra.mxu0 %v442_v28  ;;  %v441_v30 = vld [vmem:[#allocation2 + $0x178] sm:$0xff]  ;;  %v125_v62 = vld [vmem:[%s1013_s1 + $0x6] sm:$0x1] }
 0x1dc   :  { %643 = vmatprep.subr.mxu1 %v507_v20  ;;  %574 = vmatprep.subr.mxu0 %v441_v30  ;;  %752 = vpush %v125_v62 }
 0x1dd   :  { %v274_v36 = vadd.f32 %v272_v32, %v270_v34  ;;  %v257_v37 = vadd.f32 %v256_v35, %v255_v31  ;;  %644 = vmatpush2.msra.mxu1 %v506_v23  ;;  %v503_v31 = vld [vmem:[#allocation2 + $0x368] sm:$0xff]  ;;  %v440_v32 = vld [vmem:[#allocation2 + $0x170] sm:$0xff]  ;;  %v501_v35 = vld [vmem:[#allocation2 + $0x358] sm:$0xff] }
 0x1de   :  { %645 = vmatprep.subr.mxu1 %v505_v26  ;;  %v439_v34 = vld [vmem:[#allocation2 + $0x168] sm:$0xff]  ;;  %575 = vmatpush2.msra.mxu0 %v440_v32 }
 0x1df   :  { %v749_v39 = vmul.f32 -1.442695, %v274_v36  ;;  %v271_v40 = vadd.f32 %v747_v29, %v257_v37  ;;  %v504_v29 = vld [vmem:[#allocation2 + $0x370] sm:$0xff]  ;;  %v438_v36 = vld [vmem:[#allocation2 + $0x160] sm:$0xff]  ;;  %576 = vmatprep.subr.mxu0 %v439_v34 }
 0x1e0   :  { %646 = vmatpush2.msra.mxu1 %v504_v29  ;;  %v500_v37 = vld [vmem:[#allocation2 + $0x350] sm:$0xff]  ;;  %577 = vmatpush2.msra.mxu0 %v438_v36 }
 0x1e1   :  { %761 = vpow2.f32 %v749_v39  ;;  %v273_v41 = vadd.f32 %v271_v40, %v269_v38  ;;  %647 = vmatprep.subr.mxu1 %v503_v31  ;;  %v437_v38 = vld [vmem:[#allocation2 + $0x158] sm:$0xff]  ;;  %v499_v39 = vld [vmem:[#allocation2 + $0x348] sm:$0xff]  ;;  %v436_v40 = vld [vmem:[#allocation2 + $0x150] sm:$0xff] }
 0x1e2   :  { %648 = vmatpush2.msra.mxu1 %v502_v33  ;;  %578 = vmatprep.subr.mxu0 %v437_v38 }
 0x1e3   :  { %v748_v42 = vmul.f32 -1.442695, %v273_v41  ;;  %649 = vmatprep.subr.mxu1 %v501_v35  ;;  %v498_v41 = vld [vmem:[#allocation2 + $0x340] sm:$0xff]  ;;  %579 = vmatpush2.msra.mxu0 %v436_v40 }
 0x1e4   :  { %650 = vmatpush2.msra.mxu1 %v500_v37 }
 0x1e5   :  { %763 = vpow2.f32 %v748_v42  ;;  %v435_v42 = vld [vmem:[#allocation2 + $0x148] sm:$0xff]  ;;  %651 = vmatprep.subr.mxu1 %v499_v39 }
 0x1e6   :  { %652 = vmatpush2.msra.mxu1 %v498_v41  ;;  %580 = vmatprep.subr.mxu0 %v435_v42 }
 0x1ee   :  { %v762_v43 = vpop.eup %761 }
 0x1ef   :  { %v282_v44 = vadd.f32 1.0, %v762_v43  ;;  %v497_v43 = vld [vmem:[#allocation2 + $0x338] sm:$0xff] }
 0x1f0   :  { %653 = vmatprep.subr.mxu1 %v497_v43 }
 0x1f1   :  { %765 = vrcp.f32 %v282_v44  ;;  %v434_v44 = vld [vmem:[#allocation2 + $0x140] sm:$0xff] }
 0x1f2   :  { %v764_v45 = vpop.eup %763  ;;  %581 = vmatpush2.msra.mxu0 %v434_v44 }
 0x1f3   :  { %v281_v46 = vadd.f32 1.0, %v764_v45  ;;  %v496_v45 = vld [vmem:[#allocation2 + $0x330] sm:$0xff] }
 0x1f4   :  { %654 = vmatpush2.msra.mxu1 %v496_v45 }
 0x1f5   :  { %767 = vrcp.f32 %v281_v46  ;;  %v433_v46 = vld [vmem:[#allocation2 + $0x138] sm:$0xff]  ;;  %655 = vmatprep.subr.mxu1 %v495_v48 }
 0x1f6   :  { %582 = vmatprep.subr.mxu0 %v433_v46  ;;  %656 = vmatpush2.msra.mxu1 %v494_v50 }
 0x1f7   :  { %583 = vmatpush2.msra.mxu0 %v432_v49  ;;  %657 = vmatprep.subr.mxu1 %v493_v52 }
 0x1f8   :  { %584 = vmatprep.subr.mxu0 %v431_v51  ;;  %658 = vmatpush2.msra.mxu1 %v492_v55 }
 0x1f9   :  { %585 = vmatpush2.msra.mxu0 %v430_v54  ;;  %659 = vmatprep.subr.mxu1 %v491_v57 }
 0x1fa   :  { %586 = vmatprep.subr.mxu0 %v429_v56  ;;  %660 = vmatpush2.msra.mxu1 %v490_v59 }
 0x1fb   :  { %587 = vmatpush2.msra.mxu0 %v428_v58 }
 0x1fc   :  { %588 = vmatprep.subr.mxu0 %v427_v60 }
 0x1fd   :  { %589 = vmatpush2.msra.mxu0 %v426_v61 }
 0x1fe   :  { %v766_v13 = vpop.eup %765 }
 0x1ff   :  { %v301_v16 = vrot.slane %v766_v13, %v896_v53 }
 0x201   :  { %303 = vbcast.lane.b32.xlu0 %v301_v16, 256 }
 0x202   :  { %v768_v24 = vpop.eup %767 }
 0x203   :  { %v290_v27 = vrot.slane %v768_v24, %v896_v53 }
 0x205   :  { %292 = vbcast.lane.b32.xlu1 %v290_v27, 256 }
 0x209   :  { %296 = vbcast.lane.b32.xlu1 %v290_v27, 264 }
 0x20d   :  { %307 = vbcast.lane.b32.xlu1 %v301_v16, 264  ;;  %s753_s1 = spop %752 }
 0x273   :  { %v304_v13 = vpop.permute.xlu0 %303 }
 0x274   :  { %v954_v20 = vmul.f32 %v304_v13, %v835_v1 }
 0x277   :  { %v293_v63 = vpop.permute.xlu1 %292 }
 0x278   :  { %v931_v7 = vmul.f32 %v293_v63, %v840_v2  ;;  %v934_v10 = vmul.f32 %v293_v63, %v847_v4 }
 0x27b   :  { %v297_v3 = vpop.permute.xlu1 %296 }
 0x27c   :  { %v937_v11 = vmul.f32 %v297_v3, %v864_v8  ;;  %v940_v12 = vmul.f32 %v297_v3, %v869_v9  ;;  %v951_v9 = vmul.f32 %v304_v13, %v830_v0 }
 0x27e   :  { %v317_v14 = vadd.f32 %v937_v11, %v931_v7  ;;  %v324_v15 = vadd.f32 %v940_v12, %v934_v10  ;;  %v350_v2 = vmax.f32 %v931_v7, %v937_v11  ;;  %v357_v4 = vmax.f32 %v934_v10, %v940_v12 }
 0x27f   :  { %v308_v16 = vpop.permute.xlu1 %307 }
 0x280   :  { %v318_v17 = vrot.slane %v317_v14, 4  ;;  %v325_v8 = vrot.slane %v324_v15, 4  ;;  %v351_v18 = vrot.slane %v350_v2, 4  ;;  %v358_v19 = vrot.slane %v357_v4, 4 }
 0x281   :  { %v957_v22 = vmul.f32 %v308_v16, %v852_v5  ;;  %v960_v23 = vmul.f32 %v308_v16, %v857_v6 }
 0x282   :  { %v319_v24 = vadd.f32 %v318_v17, %v317_v14  ;;  %v326_v25 = vadd.f32 %v325_v8, %v324_v15  ;;  %v352_v26 = vmax.f32 %v350_v2, %v351_v18  ;;  %v359_v27 = vmax.f32 %v357_v4, %v358_v19 }
 0x283   :  { %v331_v28 = vadd.f32 %v957_v22, %v951_v9  ;;  %v338_v0 = vadd.f32 %v960_v23, %v954_v20  ;;  %v364_v1 = vmax.f32 %v951_v9, %v957_v22  ;;  %v371_v5 = vmax.f32 %v954_v20, %v960_v23 }
 0x284   :  { %v320_v29 = vrot.slane %v319_v24, 2  ;;  %v360_v30 = vrot.slane %v359_v27, 2  ;;  %v353_v6 = vrot.slane %v352_v26, 2  ;;  %v327_v31 = vrot.slane %v326_v25, 2 }
 0x285   :  { %v332_v32 = vrot.slane %v331_v28, 4  ;;  %v339_v33 = vrot.slane %v338_v0, 4  ;;  %v365_v34 = vrot.slane %v364_v1, 4  ;;  %v372_v35 = vrot.slane %v371_v5, 4 }
 0x286   :  { %v361_v36 = vmax.f32 %v359_v27, %v360_v30  ;;  %v354_v37 = vmax.f32 %v352_v26, %v353_v6  ;;  %v328_v38 = vadd.f32 %v327_v31, %v326_v25  ;;  %v321_v39 = vadd.f32 %v320_v29, %v319_v24 }
 0x287   :  { %v333_v40 = vadd.f32 %v332_v32, %v331_v28  ;;  %v340_v41 = vadd.f32 %v339_v33, %v338_v0  ;;  %v366_v42 = vmax.f32 %v364_v1, %v365_v34  ;;  %v373_v43 = vmax.f32 %v371_v5, %v372_v35 }
 0x288   :  { %v329_v44 = vrot.slane %v328_v38, 1  ;;  %v322_v45 = vrot.slane %v321_v39, 1  ;;  %v362_v51 = vrot.slane %v361_v36, 1  ;;  %v355_v52 = vrot.slane %v354_v37, 1 }
 0x289   :  { %v334_v46 = vrot.slane %v333_v40, 2  ;;  %v367_v48 = vrot.slane %v366_v42, 2  ;;  %v374_v49 = vrot.slane %v373_v43, 2  ;;  %v341_v50 = vrot.slane %v340_v41, 2 }
 0x28a   :  { %v330_v58 = vadd.f32 %v329_v44, %v328_v38  ;;  %v323_v59 = vadd.f32 %v322_v45, %v321_v39  ;;  %v363_v3 = vmax.f32 %v361_v36, %v362_v51  ;;  %v356_v13 = vmax.f32 %v354_v37, %v355_v52 }
 0x28b   :  { %v375_v54 = vmax.f32 %v373_v43, %v374_v49  ;;  %v368_v55 = vmax.f32 %v366_v42, %v367_v48  ;;  %v342_v56 = vadd.f32 %v341_v50, %v340_v41  ;;  %v335_v57 = vadd.f32 %v334_v46, %v333_v40 }
 0x28c   :  { %v347_v16 = vmul.f32 0.0625, %v330_v58  ;;  %v346_v17 = vmul.f32 0.0625, %v323_v59  ;;  %v524_v27 = vstv %s753_s1  ;;  %v711_v41 = vsub.s32 1, %v883_v21 }
 0x28d   :  { %v376_v60 = vrot.slane %v375_v54, 1  ;;  %v369_v61 = vrot.slane %v368_v55, 1  ;;  %v343_v62 = vrot.slane %v342_v56, 1  ;;  %v336_v63 = vrot.slane %v335_v57, 1 }
 0x28f   :  { %v377_v14 = vmax.f32 %v375_v54, %v376_v60  ;;  %v370_v15 = vmax.f32 %v368_v55, %v369_v61  ;;  %v344_v2 = vadd.f32 %v343_v62, %v342_v56  ;;  %v337_v4 = vadd.f32 %v336_v63, %v335_v57 }
 0x291   :  { %v391_v8 = vsel %vm91_vm1, %v377_v14, %v363_v3  ;;  %v390_v18 = vsel %vm91_vm1, %v370_v15, %v356_v13  ;;  %v349_v19 = vmul.f32 0.0625, %v344_v2  ;;  %v348_v24 = vmul.f32 0.0625, %v337_v4 }
 0x292   :  { %661 = vmatprep.mubr.f32.mxu1 %v391_v8 }
 0x293   :  { %662 = vmatmul.mubr.f32.vlgmr.msra.gmra.mxu1 %v390_v18  ;;  %v383_v25 = vsel %vm91_vm1, %v349_v19, %v347_v16  ;;  %v382_v26 = vsel %vm91_vm1, %v348_v24, %v346_v17 }
 0x294   :  { %590 = vmatprep.mubr.f32.mxu0 %v383_v25 }
 0x295   :  { %591 = vmatmul.mubr.f32.vlgmr.msra.gmra.mxu0 %v382_v26 }
 0x353   :  { %v663_v28 = vpop.f32.mrf.mxu1 }
 0x355   :  { %v592_v0 = vpop.f32.mrf.mxu0  ;;  %v665_v6 = vpop.f32.mrf.mxu1 }
 0x356   :  { %v593_v1 = vadd.f32 %v592_v0, %v524_v27 }
 0x357   :  { %v594_v5 = vpop.f32.mrf.mxu0 }
 0x358   :  { %v664_v29 = vadd.f32 %v663_v28, %v593_v1  ;;  %v595_v30 = vadd.f32 %v594_v5, %v524_v27 }
 0x35a   :  { %v750_v31 = vmul.f32 -1.442695, %v664_v29  ;;  %v666_v32 = vadd.f32 %v665_v6, %v595_v30 }
 0x35c   :  { %769 = vpow2.f32 %v750_v31  ;;  %v751_v33 = vmul.f32 -1.442695, %v666_v32 }
 0x35e   :  { %771 = vpow2.f32 %v751_v33 }
 0x369   :  { %v770_v34 = vpop.eup %769 }
 0x36a   :  { %v674_v35 = vadd.f32 1.0, %v770_v34 }
 0x36b   :  { %v772_v36 = vpop.eup %771 }
 0x36c   :  { %v675_v37 = vadd.f32 1.0, %v772_v36  ;;  %773 = vrcp.f32 %v674_v35 }
 0x36e   :  { %775 = vrcp.f32 %v675_v37 }
 0x379   :  { %v774_v38 = vpop.eup %773 }
 0x37b   :  { %v776_v39 = vpop.eup %775 }
 0x37c   :  { %v682_v40 = vcombine.low %v774_v38, %v776_v39 }
 0x37e   :  { %v689_v42 = vrot.slane %v682_v40, %v890_v47 }
 0x380   :  { %v690_v43 = vcombine.high %v689_v42, %v689_v42  ;;  %v697_v44 = vrot.slane %v689_v42, %v890_v47 }
 0x382   :  { %v704_v45 = vrot.slane %v690_v43, %v890_v47  ;;  %v708_v46 = vrot.slane %v697_v44, %v896_v53  ;;  %v712_v48 = vrot.slane %v697_v44, %v711_v41 }
 0x384   :  { %v716_v49 = vrot.slane %v704_v45, %v896_v53  ;;  %v720_v50 = vrot.slane %v704_v45, %v711_v41  ;;  %v725_v51 = vmul.f32 %v708_v46, %v931_v7  ;;  %v726_v52 = vmul.f32 %v712_v48, %v934_v10 }
 0x385   :  { %v727_v54 = vmul.f32 %v708_v46, %v937_v11  ;;  %v728_v21 = vmul.f32 %v712_v48, %v940_v12 }
 0x386   :  { %v729_v55 = vmul.f32 %v716_v49, %v951_v9  ;;  %v730_v56 = vmul.f32 %v720_v50, %v954_v20  ;;  %v731_v47 = vmul.f32 %v716_v49, %v957_v22  ;;  %v732_v57 = vmul.f32 %v720_v50, %v960_v23  ;;  %733 = vst [vmem:[%s1015_s3] sm:$0xff] %v725_v51 }
 0x387   :  { %734 = vst [vmem:[%s1015_s3 + $0x8] sm:$0xff] %v726_v52  ;;  %735 = vst [vmem:[%s1015_s3 + $0x10] sm:$0xff] %v727_v54 }
 0x388   :  { %736 = vst [vmem:[%s1015_s3 + $0x18] sm:$0xff] %v728_v21  ;;  %737 = vst [vmem:[%s1015_s3 + $0x20] sm:$0xff] %v729_v55 }
 0x389   :  { %738 = vst [vmem:[%s1015_s3 + $0x28] sm:$0xff] %v730_v56  ;;  %739 = vst [vmem:[%s1015_s3 + $0x30] sm:$0xff] %v731_v47 }
 0x38a   :  { %740 = vst [vmem:[%s1015_s3 + $0x38] sm:$0xff] %v732_v57 }
 0x38b   :  { %745 = vsyncpa [#allocation3], 1 }

</bundles_post_ra>
